<compile_context>
chip_gen: v7x
topology: tpu7x:2x2x1
jax: 0.10.0
libtpu: 0.0.40
codegen_flags: <defaults>
</compile_context>

<pallas_src>
import functools

import jax
import jax.numpy as jnp
from jax.experimental import pallas as pl
from jax.experimental.pallas import tpu as pltpu


def _align8(n):
    return (n + 7) // 8 * 8


def _row_offsets(window, input_size, hidden):
    """Sublane offsets of the blocks packed into the weight slab (8-aligned)."""
    WI = window * input_size
    r_sx = 0                                   # (WI, I)   attention x-weight block
    r_wih = _align8(r_sx + WI)                 # (WI, 4H)  zero-padded W_ih^T
    r_whh = _align8(r_wih + WI)                # (2H, 4H)  zero-padded W_hh^T
    r_tex = _align8(r_whh + 2 * hidden)        # (I, WI)   0/1 alpha-tiling matrix
    r_b = _align8(r_tex + input_size)          # (1, 4H)   b_ih + b_hh
    r_misc = _align8(r_b + 1)                  # (1, 2H+1) [w_h | w_s | attn_bias]
    r_tot = r_misc + 1
    return r_sx, r_wih, r_whh, r_tex, r_b, r_misc, r_tot


def attention_lstm_kernel(xf_ref, hc0_ref, wslab_ref, xt_ref, hc1_ref, *, W, I, H):
    WI = W * I
    r_sx, r_wih, r_whh, r_tex, r_b, r_misc, _ = _row_offsets(W, I, H)

    xf = xf_ref[...]                                    # (B, W*I)  lane-dense X
    hc0 = hc0_ref[...]                                  # (B, 2H)   [h0 | s0]
    s0 = hc0[:, H:2 * H]                                # (B, H)

    # ---- attention scores: Linear([h0, s0, X[:, :, i]]) for every feature i ----
    # x-part via one MXU matmul against the (zero-padded) SX block of the slab.
    sx = jnp.dot(xf, wslab_ref[r_sx:r_sx + WI, :],
                 preferred_element_type=jnp.float32)[:, 0:I]        # (B, I)
    # h/s-part via VPU multiply + lane reduce (avoids a 1-lane-output matmul).
    w_hs = wslab_ref[r_misc:r_misc + 1, 0:2 * H]                    # (1, 2H)
    ab = wslab_ref[r_misc:r_misc + 1, 2 * H:2 * H + 1]              # (1, 1)
    base = jnp.sum(hc0 * w_hs, axis=-1, keepdims=True) + ab         # (B, 1)
    score = sx + base                                               # (B, I)

    # softmax over input_size (exact divide; see correctness note in header)
    m = jnp.max(score, axis=-1, keepdims=True)
    e = jnp.exp(score - m)
    alpha = e / jnp.sum(e, axis=-1, keepdims=True)                  # (B, I)

    # ---- lane-dense X_tilde (B, W*I): tile alpha over timesteps via 0/1 matmul ----
    alpha_tiled = jnp.dot(alpha, wslab_ref[r_tex:r_tex + I, :],
                          preferred_element_type=jnp.float32)[:, 0:WI]
    x_tilde = alpha_tiled * xf
    xt_ref[...] = x_tilde                                # one unmasked full-width store

    # ---- one LSTM cell step on x_tilde of the final timestep ----
    # W_ih is zero-padded over (W*I, 4H) so X_tilde is the LHS directly;
    # W_hh is zero-padded over (2H, 4H) so packed hc0 is the LHS directly.
    gates = (jnp.dot(x_tilde, wslab_ref[r_wih:r_wih + WI, :],
                     preferred_element_type=jnp.float32)
             + jnp.dot(hc0, wslab_ref[r_whh:r_whh + 2 * H, :],
                       preferred_element_type=jnp.float32)
             + wslab_ref[r_b:r_b + 1, :])[:, 0:4 * H]    # (B, 4H), gate order i,f,g,o

    sig = jax.nn.sigmoid(gates)                          # single full-vreg EUP pass
    i_g = sig[:, 0:H]
    f_g = sig[:, H:2 * H]
    o_g = sig[:, 3 * H:4 * H]
    g_g = jnp.tanh(gates[:, 2 * H:3 * H])

    c1 = f_g * s0 + i_g * g_g
    h1 = o_g * jnp.tanh(c1)
    hc1_ref[:, 0:H] = h1                                 # packed state output
    hc1_ref[:, H:2 * H] = c1


def pack_weights(attn_w, attn_b, w_ih, w_hh, b_ih, b_hh, *, input_size, hidden, window):
    """Build the single (rows, lanes) f32 weight slab consumed by the kernel."""
    I, H, W = input_size, hidden, window
    WI = W * I
    r_sx, r_wih, r_whh, r_tex, r_b, r_misc, r_tot = _row_offsets(W, I, H)
    slab_w = max(4 * H, WI, 2 * H + 1)
    slab = jnp.zeros((r_tot, slab_w), jnp.float32)

    w_h, w_s, w_x = attn_w[:H], attn_w[H:2 * H], attn_w[2 * H:]
    eye = jnp.eye(I, dtype=jnp.float32)

    # SX block: row t*I+i, col i = w_x[t]  ->  (Xf @ SX)[b, i] = sum_t X[b,t,i]*w_x[t]
    sx = (w_x[:, None, None] * eye[None, :, :]).reshape(WI, I)
    slab = slab.at[r_sx:r_sx + WI, 0:I].set(sx)
    # W_ih^T placed at the last-timestep rows of the (W*I, 4H) block
    slab = slab.at[r_wih + (W - 1) * I:r_wih + WI, 0:4 * H].set(w_ih.T)
    # W_hh^T in the h-half of the (2H, 4H) block (s-half stays zero)
    slab = slab.at[r_whh:r_whh + H, 0:4 * H].set(w_hh.T)
    # 0/1 alpha-tiling matrix: (alpha @ T)[b, t*I+i] = alpha[b, i]
    slab = slab.at[r_tex:r_tex + I, 0:WI].set(jnp.tile(eye, (1, W)))
    # fused LSTM bias and attention h/s weights + bias
    slab = slab.at[r_b, 0:4 * H].set(b_ih + b_hh)
    slab = slab.at[r_misc, 0:H].set(w_h)
    slab = slab.at[r_misc, H:2 * H].set(w_s)
    slab = slab.at[r_misc, 2 * H].set(attn_b[0])
    return slab


@jax.jit
def attention_lstm_forward(X, hc, wslab):
    """X: (B, W, I); hc: (B, 2H) packed [h_n | s_n]; wslab: packed weights.

    Returns (X_tilde (B, W*I), hc_new (B, 2H))."""
    B, W, I = X.shape
    H = hc.shape[1] // 2
    Xf = X.reshape(B, W * I)                 # contiguous flatten (free under jit)

    vmem = pl.BlockSpec(memory_space=pltpu.MemorySpace.VMEM)
    kernel = functools.partial(attention_lstm_kernel, W=W, I=I, H=H)
    return pl.pallas_call(
        kernel,
        out_shape=(jax.ShapeDtypeStruct((B, W * I), jnp.float32),
                   jax.ShapeDtypeStruct((B, 2 * H), jnp.float32)),
        in_specs=[vmem, vmem, vmem],
        out_specs=(vmem, vmem),
    )(Xf, hc, wslab)


def attention_lstm_reference(X, h0, s0, attn_w, attn_b, w_ih, w_hh, b_ih, b_hh):
    """Pure-JAX reference mirroring the PyTorch module's forward."""
    B, W, I = X.shape
    H = h0.shape[-1]
    hi = jax.lax.Precision.HIGHEST
    hp = jnp.broadcast_to(h0[:, None, :], (B, I, H))
    sp = jnp.broadcast_to(s0[:, None, :], (B, I, H))
    xc = jnp.concatenate([hp, sp, jnp.transpose(X, (0, 2, 1))], axis=-1)
    score = jnp.einsum("bif,f->bi", xc, attn_w, precision=hi) + attn_b[0]
    alpha = jax.nn.softmax(score, axis=-1)
    X_tilde = alpha[:, None, :] * X
    x_last = alpha * X[:, W - 1, :]
    gates = (jnp.dot(x_last, w_ih.T, precision=hi)
             + jnp.dot(h0, w_hh.T, precision=hi) + b_ih + b_hh)
    i_g = jax.nn.sigmoid(gates[:, 0:H])
    f_g = jax.nn.sigmoid(gates[:, H:2 * H])
    g_g = jnp.tanh(gates[:, 2 * H:3 * H])
    o_g = jax.nn.sigmoid(gates[:, 3 * H:4 * H])
    c1 = f_g * s0 + i_g * g_g
    h1 = o_g * jnp.tanh(c1)
    return X_tilde.reshape(B, W * I), h1, c1


if __name__ == "__main__":
    # batch=2, window_length=8, input_size=16, encoder_num_hidden=32
    B, W, I, H = 2, 8, 16, 32
    key = jax.random.PRNGKey(0)
    kx1, kx2, k1, k2, k3, k4, k5, k6 = jax.random.split(key, 8)

    X1 = jax.random.normal(kx1, (B, W, I), jnp.float32)
    X2 = jax.random.normal(kx2, (B, W, I), jnp.float32)

    # encoder_attn: Linear(2H + W -> 1); encoder_lstm: LSTM(I -> H), gates (i,f,g,o)
    lim_a = float(2 * H + W) ** -0.5
    attn_w = jax.random.uniform(k1, (2 * H + W,), jnp.float32, -lim_a, lim_a)
    attn_b = jax.random.uniform(k2, (1,), jnp.float32, -lim_a, lim_a)
    lim = float(H) ** -0.5
    w_ih = jax.random.uniform(k3, (4 * H, I), jnp.float32, -lim, lim)
    w_hh = jax.random.uniform(k4, (4 * H, H), jnp.float32, -lim, lim)
    b_ih = jax.random.uniform(k5, (4 * H,), jnp.float32, -lim, lim)
    b_hh = jax.random.uniform(k6, (4 * H,), jnp.float32, -lim, lim)

    wslab = pack_weights(attn_w, attn_b, w_ih, w_hh, b_ih, b_hh,
                         input_size=I, hidden=H, window=W)
    hc0 = jnp.zeros((B, 2 * H), jnp.float32)     # module initializes h_n = s_n = 0

    # two chained forward calls (mirrors the module mutating h_n / s_n each call)
    Xt1, hc1 = attention_lstm_forward(X1, hc0, wslab)
    Xt2, hc2 = attention_lstm_forward(X2, hc1, wslab)
    jax.block_until_ready((Xt1, hc1, Xt2, hc2))

    # correctness vs pure-JAX reference
    def check(name, got, want, tol=1e-3):
        err = float(jnp.max(jnp.abs(got - want)))
        assert err < tol, f"{name}: max abs err {err}"

    r_xt1, r_h1, r_c1 = attention_lstm_reference(
        X1, hc0[:, :H], hc0[:, H:], attn_w, attn_b, w_ih, w_hh, b_ih, b_hh)
    r_xt2, r_h2, r_c2 = attention_lstm_reference(
        X2, r_h1, r_c1, attn_w, attn_b, w_ih, w_hh, b_ih, b_hh)
    check("X_tilde step1", Xt1, r_xt1)
    check("h_n step1", hc1[:, :H], r_h1)
    check("s_n step1", hc1[:, H:], r_c1)
    check("X_tilde step2", Xt2, r_xt2)
    check("h_n step2", hc2[:, :H], r_h2)
    check("s_n step2", hc2[:, H:], r_c2)

    # module-facing shapes: X_tilde (B, W*I), h_n / s_n (1, B, H)
    h_n, s_n = hc2[:, :H][None], hc2[:, H:][None]
    assert Xt2.shape == (B, W * I)
    assert h_n.shape == (1, B, H) and s_n.shape == (1, B, H)
    print("KERNEL_OK")
</pallas_src>

<mosaic_0001>
module attributes {stable_mosaic.version = 11 : i64} {
  func.func @attention_lstm_kernel(%arg0: memref<2x128xf32, #tpu.memory_space<vmem>>, %arg1: memref<2x64xf32, #tpu.memory_space<vmem>>, %arg2: memref<345x128xf32, #tpu.memory_space<vmem>>, %arg3: memref<2x128xf32, #tpu.memory_space<vmem>>, %arg4: memref<2x64xf32, #tpu.memory_space<vmem>>) attributes {dimension_semantics = [], scalar_prefetch = 0 : i64, scratch_operands = 0 : i64, tpu.core_type = #tpu.core_type<tc>} {
    %c0 = arith.constant 0 : index
    %c0_0 = arith.constant 0 : index
    %0 = vector.load %arg0[%c0, %c0_0] : memref<2x128xf32, #tpu.memory_space<vmem>>, vector<2x128xf32>
    %c0_1 = arith.constant 0 : index
    %c0_2 = arith.constant 0 : index
    %1 = vector.load %arg1[%c0_1, %c0_2] : memref<2x64xf32, #tpu.memory_space<vmem>>, vector<2x64xf32>
    %2 = vector.extract_strided_slice %1 {offsets = [0, 32], sizes = [2, 32], strides = [1, 1]} : vector<2x64xf32> to vector<2x32xf32>
    %c0_3 = arith.constant 0 : index
    %c0_4 = arith.constant 0 : index
    %3 = vector.load %arg2[%c0_3, %c0_4] : memref<345x128xf32, #tpu.memory_space<vmem>>, vector<128x128xf32>
    %cst = arith.constant dense<0.000000e+00> : vector<2x128xf32>
    %4 = tpu.matmul %0, %3, %cst {dimension_numbers = #tpu.dot_dimension_numbers<[1], [0], [0], [1], [0, 0, 1, 1], [], []>} : vector<2x128xf32>, vector<128x128xf32>, vector<2x128xf32> -> vector<2x128xf32>
    %5 = vector.extract_strided_slice %4 {offsets = [0, 0], sizes = [2, 16], strides = [1, 1]} : vector<2x128xf32> to vector<2x16xf32>
    %c344 = arith.constant 344 : index
    %c0_5 = arith.constant 0 : index
    %6 = vector.load %arg2[%c344, %c0_5] : memref<345x128xf32, #tpu.memory_space<vmem>>, vector<1x64xf32>
    %c344_6 = arith.constant 344 : index
    %c64 = arith.constant 64 : index
    %7 = vector.load %arg2[%c344_6, %c64] : memref<345x128xf32, #tpu.memory_space<vmem>>, vector<1x1xf32>
    %8 = vector.broadcast %6 : vector<1x64xf32> to vector<2x64xf32>
    %9 = arith.mulf %1, %8 : vector<2x64xf32>
    %cst_7 = arith.constant dense<0.000000e+00> : vector<2xf32>
    %10 = vector.multi_reduction <add>, %9, %cst_7 [1] : vector<2x64xf32> to vector<2xf32>
    %11 = vector.shape_cast %10 : vector<2xf32> to vector<2x1xf32>
    %12 = vector.broadcast %7 : vector<1x1xf32> to vector<2x1xf32>
    %13 = arith.addf %11, %12 : vector<2x1xf32>
    %14 = vector.broadcast %13 : vector<2x1xf32> to vector<2x16xf32>
    %15 = arith.addf %5, %14 : vector<2x16xf32>
    %cst_8 = arith.constant dense<0xFF800000> : vector<2xf32>
    %16 = vector.multi_reduction <maximumf>, %15, %cst_8 [1] : vector<2x16xf32> to vector<2xf32>
    %17 = vector.shape_cast %16 : vector<2xf32> to vector<2x1xf32>
    %18 = vector.broadcast %17 : vector<2x1xf32> to vector<2x16xf32>
    %19 = arith.subf %15, %18 : vector<2x16xf32>
    %20 = math.exp %19 : vector<2x16xf32>
    %cst_9 = arith.constant dense<0.000000e+00> : vector<2xf32>
    %21 = vector.multi_reduction <add>, %20, %cst_9 [1] : vector<2x16xf32> to vector<2xf32>
    %22 = vector.shape_cast %21 : vector<2xf32> to vector<2x1xf32>
    %23 = vector.broadcast %22 : vector<2x1xf32> to vector<2x16xf32>
    %24 = arith.divf %20, %23 : vector<2x16xf32>
    %c320 = arith.constant 320 : index
    %c0_10 = arith.constant 0 : index
    %25 = vector.load %arg2[%c320, %c0_10] : memref<345x128xf32, #tpu.memory_space<vmem>>, vector<16x128xf32>
    %cst_11 = arith.constant dense<0.000000e+00> : vector<2x128xf32>
    %26 = tpu.matmul %24, %25, %cst_11 {dimension_numbers = #tpu.dot_dimension_numbers<[1], [0], [0], [1], [0, 0, 1, 1], [], []>} : vector<2x16xf32>, vector<16x128xf32>, vector<2x128xf32> -> vector<2x128xf32>
    %27 = arith.mulf %26, %0 : vector<2x128xf32>
    %c0_12 = arith.constant 0 : index
    %c0_13 = arith.constant 0 : index
    %28 = vector.load %arg3[%c0_12, %c0_13] : memref<2x128xf32, #tpu.memory_space<vmem>>, vector<2x128xf32>
    tpu.vector_store %arg3[%c0_12, %c0_13], %27 {strides = array<i32>} : memref<2x128xf32, #tpu.memory_space<vmem>>, vector<2x128xf32>,
    %c128 = arith.constant 128 : index
    %c0_14 = arith.constant 0 : index
    %29 = vector.load %arg2[%c128, %c0_14] : memref<345x128xf32, #tpu.memory_space<vmem>>, vector<128x128xf32>
    %cst_15 = arith.constant dense<0.000000e+00> : vector<2x128xf32>
    %30 = tpu.matmul %27, %29, %cst_15 {dimension_numbers = #tpu.dot_dimension_numbers<[1], [0], [0], [1], [0, 0, 1, 1], [], []>} : vector<2x128xf32>, vector<128x128xf32>, vector<2x128xf32> -> vector<2x128xf32>
    %c256 = arith.constant 256 : index
    %c0_16 = arith.constant 0 : index
    %31 = vector.load %arg2[%c256, %c0_16] : memref<345x128xf32, #tpu.memory_space<vmem>>, vector<64x128xf32>
    %cst_17 = arith.constant dense<0.000000e+00> : vector<2x128xf32>
    %32 = tpu.matmul %1, %31, %cst_17 {dimension_numbers = #tpu.dot_dimension_numbers<[1], [0], [0], [1], [0, 0, 1, 1], [], []>} : vector<2x64xf32>, vector<64x128xf32>, vector<2x128xf32> -> vector<2x128xf32>
    %33 = arith.addf %30, %32 : vector<2x128xf32>
    %c336 = arith.constant 336 : index
    %c0_18 = arith.constant 0 : index
    %34 = vector.load %arg2[%c336, %c0_18] : memref<345x128xf32, #tpu.memory_space<vmem>>, vector<1x128xf32>
    %35 = vector.broadcast %34 : vector<1x128xf32> to vector<2x128xf32>
    %36 = arith.addf %33, %35 : vector<2x128xf32>
    %37 = arith.negf %36 : vector<2x128xf32>
    %38 = math.exp %37 : vector<2x128xf32>
    %cst_19 = arith.constant 1.000000e+00 : f32
    %39 = vector.broadcast %cst_19 : f32 to vector<2x128xf32>
    %40 = arith.addf %39, %38 : vector<2x128xf32>
    %41 = arith.divf %39, %40 : vector<2x128xf32>
    %42 = vector.extract_strided_slice %41 {offsets = [0, 0], sizes = [2, 32], strides = [1, 1]} : vector<2x128xf32> to vector<2x32xf32>
    %43 = vector.extract_strided_slice %41 {offsets = [0, 32], sizes = [2, 32], strides = [1, 1]} : vector<2x128xf32> to vector<2x32xf32>
    %44 = vector.extract_strided_slice %41 {offsets = [0, 96], sizes = [2, 32], strides = [1, 1]} : vector<2x128xf32> to vector<2x32xf32>
    %45 = vector.extract_strided_slice %36 {offsets = [0, 64], sizes = [2, 32], strides = [1, 1]} : vector<2x128xf32> to vector<2x32xf32>
    %46 = math.tanh %45 : vector<2x32xf32>
    %47 = arith.mulf %43, %2 : vector<2x32xf32>
    %48 = arith.mulf %42, %46 : vector<2x32xf32>
    %49 = arith.addf %47, %48 : vector<2x32xf32>
    %50 = math.tanh %49 : vector<2x32xf32>
    %51 = arith.mulf %44, %50 : vector<2x32xf32>
    %c0_20 = arith.constant 0 : index
    %c0_21 = arith.constant 0 : index
    %52 = vector.load %arg4[%c0_20, %c0_21] : memref<2x64xf32, #tpu.memory_space<vmem>>, vector<2x32xf32>
    tpu.vector_store %arg4[%c0_20, %c0_21], %51 {strides = array<i32>} : memref<2x64xf32, #tpu.memory_space<vmem>>, vector<2x32xf32>,
    %c0_22 = arith.constant 0 : index
    %c32 = arith.constant 32 : index
    %53 = vector.load %arg4[%c0_22, %c32] : memref<2x64xf32, #tpu.memory_space<vmem>>, vector<2x32xf32>
    tpu.vector_store %arg4[%c0_22, %c32], %49 {strides = array<i32>} : memref<2x64xf32, #tpu.memory_space<vmem>>, vector<2x32xf32>,
    return
  }
}

</mosaic_0001>

<bundles_post_ra>
// kernel: attention_lstm_forward.1
= control target key start
LH: loop header
LB: loop body
LE: loop exit
PB: predicated region body
PF: predicated region fallthrough
CT: control target
= control target key end

     0   :  { %10 = vsyncpa [#allocation3], 0  ;;  %s888_s0 = inlined_call_operand.vmem [shape: f32[2,128], index: 0, kind: input, shape index: {}]   ;;  %s889_s1 = inlined_call_operand.vmem [shape: f32[2,64], index: 1, kind: input, shape index: {}]   ;;  %s890_s2 = inlined_call_operand.hbm [shape: f32[345,128], index: 2, kind: input, shape index: {}]   ;;  %s891_s3 = inlined_call_operand.hbm [shape: f32[2,128], index: 3, kind: output, shape index: {0}]   ;;  %s892_s4 = inlined_call_operand.hbm [shape: f32[2,64], index: 4, kind: output, shape index: {1}]  }
   0x1   :  { %11 = vsyncpa [#allocation4], 0 }
   0x2   :  { %12 = vsyncpa [#allocation7], 0  ;;  %s768_s15 = smov [#allocation2]   ;;  %s696_s19 = scalar_lea.hbm %s890_s2, 5632 }
   0x3   :  { %s22_s16 = sshll.u32 %s768_s15, 4  ;;  %p697_p0 = scmp.ne.s32.totalorder %s890_s2, %s696_s19  ;;  %s23_s16 = int_to_ptr.vmem [resolvable:$true] %s22_s16 }
   0x4   :  { %p700_p1 = scmp.lt.u32.totalorder %s696_s19, %s890_s2 }
   0x6   :  { %p702_p2 = pnand %p700_p1, %p697_p0 }
   0x8   :  { %705 = shalt.err (!%p702_p2)
}
   0x9   :  { %s706_s24 = scalar_lea.vmem %s23_s16, 5632  ;;  %p711_p4 = scmp.lt.s32.totalorder %s23_s16, %s23_s16 }
   0xa   :  { %p707_p3 = scmp.ne.s32.totalorder %s23_s16, %s706_s24  ;;  %p712_p5 = scmp.lt.s32.totalorder %s706_s24, %s706_s24 }
   0xc   :  { %p713_p6 = por %p712_p5, %p711_p4 }
   0xe   :  { %p714_p7 = pnand %p713_p6, %p707_p3 }
  0x10   :  { %717 = shalt.err (!%p714_p7)
}
  0x11   :  { %s769_s25 = smov 128   ;;  %s770_s26 = smov 8  }
  0x12   :  { %28 = dma.hbm_to_vmem [thread:$0]  %s890_s2, 5632, %s23_s16, [#allocation3], %s769_s25, %s769_s25, %s770_s26  }
  0x13   :  { %762 = dma.done.wait [#allocation3], 5632  }
  0x14   :  { %763 = vsyncadd [#allocation3], 4294961664  ;;  %v771_v0 = vmov 0.0|0.0   ;;  %vm772_vm0 = vmmov 0   ;;  %v773_v1 = vmov 0.0   ;;  %vm126_vm1 = vcmask 517120  }
  0x15   :  { %609 = vmatprep.subr.bf16.mxu0 %v771_v0  ;;  %545 = vmatprep.mubr.msk.f32.mxu0 %vm772_vm0, %v773_v1  ;;  %v825_v2 = vld [vmem:[%s889_s1] sm:$0x3]  ;;  %v462_v3 = vld [vmem:[#allocation2 + $0x158] ss:$0 sm:$0xff]  ;;  %v35_v6 = vld [vmem:[#allocation2 + $0x8] sm:$0xff]  ;;  %v774_v23 = vmov 64  }
  0x16   :  { %636 = vmatprep.subr.bf16.mxu1 %v771_v0  ;;  %571 = vmatprep.mubr.msk.f32.mxu1 %vm772_vm0, %v773_v1  ;;  %v34_v4 = vld [vmem:[#allocation2] sm:$0xff]  ;;  %v125_v5 = vmul.f32 %v462_v3, %v825_v2  ;;  %v36_v7 = vld [vmem:[#allocation2 + $0x10] sm:$0xff]  ;;  %v37_v8 = vld [vmem:[#allocation2 + $0x18] sm:$0xff]  ;;  %vm137_vm2 = vcmask 123904   ;;  %vm251_vm3 = vcmask 523264   ;;  %vm151_vm4 = vcmask 130048  }
  0x17   :  { %v610_v9 = vpack.c.bf16 %v35_v6, %v34_v4  ;;  %v613_v11 = vpack.c.bf16 %v37_v8, %v36_v7  ;;  %v38_v12 = vld [vmem:[#allocation2 + $0x20] sm:$0xff]  ;;  %v39_v13 = vld [vmem:[#allocation2 + $0x28] sm:$0xff]  ;;  %v40_v15 = vld [vmem:[#allocation2 + $0x30] sm:$0xff]  ;;  %683 = vset.pattern.permute.xlu0 %v774_v23  ;;  %s776_s5 = smov 32   ;;  %s777_s6 = smov [#allocation5]  }
  0x18   :  { %v127_v10 = vsel %vm126_vm1, %v125_v5, 0.0  ;;  %v616_v14 = vpack.c.bf16 %v39_v13, %v38_v12  ;;  %v41_v16 = vld [vmem:[#allocation2 + $0x38] sm:$0xff]  ;;  %v42_v18 = vld [vmem:[#allocation2 + $0x40] sm:$0xff]  ;;  %v43_v19 = vld [vmem:[#allocation2 + $0x48] sm:$0xff]  ;;  %s439_s7 = sshll.u32 %s777_s6, 4  ;;  %s440_s7 = int_to_ptr.vmem [resolvable:$true] %s439_s7 }
  0x19   :  { %128 = vadd.xlane.f32.xlu0 %v127_v10  ;;  %611 = vmatpush3.bf16.msra.mxu0 %v610_v9  ;;  %v619_v17 = vpack.c.bf16 %v41_v16, %v40_v15  ;;  %v622_v20 = vpack.c.bf16 %v43_v19, %v42_v18  ;;  %v44_v21 = vld [vmem:[#allocation2 + $0x50] sm:$0xff]  ;;  %v45_v22 = vld [vmem:[#allocation2 + $0x58] sm:$0xff]  ;;  %v46_v25 = vld [vmem:[#allocation2 + $0x60] sm:$0xff]  ;;  %s718_s8 = scalar_lea.vmem %s440_s7, 32  ;;  %p723_p9 = scmp.lt.s32.totalorder %s440_s7, %s440_s7 }
  0x1a   :  { %612 = vmatprep.subr.bf16.mxu0 %v771_v0  ;;  %v625_v24 = vpack.c.bf16 %v45_v22, %v44_v21  ;;  %v47_v26 = vld [vmem:[#allocation2 + $0x68] sm:$0xff]  ;;  %v48_v28 = vld [vmem:[#allocation2 + $0x70] sm:$0xff]  ;;  %v49_v29 = vld [vmem:[#allocation2 + $0x78] sm:$0xff]  ;;  %p719_p8 = scmp.ne.s32.totalorder %s440_s7, %s718_s8  ;;  %p724_p10 = scmp.lt.s32.totalorder %s718_s8, %s718_s8 }
  0x1b   :  { %v628_v27 = vpack.c.bf16 %v47_v26, %v46_v25  ;;  %v631_v30 = vpack.c.bf16 %v49_v29, %v48_v28  ;;  %v838_v31 = vld [vmem:[%s888_s0] sm:$0x3]  ;;  %v150_v45 = vld [vmem:[#allocation2 + $0x148] sm:$0xff]  ;;  %v245_v49 = vld [vmem:[#allocation2 + $0x110] sm:$0xff]  ;;  %s775_s0 = smov 64  }
  0x1c   :  { %v149_v44 = vld [vmem:[#allocation2 + $0x140] sm:$0xff]  ;;  %v244_v48 = vld [vmem:[#allocation2 + $0x108] sm:$0xff]  ;;  %v246_v51 = vld [vmem:[#allocation2 + $0x118] sm:$0xff]  ;;  %p725_p11 = por %p724_p10, %p723_p9 }
  0x1d   :  { %614 = vmatpush3.bf16.msra.mxu0 %v613_v11  ;;  %v634_v46 = vpack.c.bf16 %v150_v45, %v149_v44  ;;  %v243_v47 = vld [vmem:[#allocation2 + $0x100] sm:$0xff]  ;;  %v640_v52 = vpack.c.bf16 %v246_v51, %v245_v49  ;;  %v248_v54 = vld [vmem:[#allocation2 + $0x128] sm:$0xff]  ;;  %v249_v56 = vld [vmem:[#allocation2 + $0x130] sm:$0xff] }
  0x1e   :  { %615 = vmatprep.subr.bf16.mxu0 %v771_v0  ;;  %v637_v50 = vpack.c.bf16 %v244_v48, %v243_v47  ;;  %v247_v53 = vld [vmem:[#allocation2 + $0x120] sm:$0xff]  ;;  %v250_v57 = vld [vmem:[#allocation2 + $0x138] sm:$0xff]  ;;  %v228_v60 = vld [vmem:[#allocation2 + $0x88] sm:$0xff]  ;;  %p726_p12 = pnand %p725_p11, %p719_p8 }
  0x1f   :  { %v643_v55 = vpack.c.bf16 %v248_v54, %v247_v53  ;;  %v646_v58 = vpack.c.bf16 %v250_v57, %v249_v56  ;;  %v227_v59 = vld [vmem:[#allocation2 + $0x80] sm:$0xff]  ;;  %v229_v62 = vld [vmem:[#allocation2 + $0x90] sm:$0xff]  ;;  %v230_v63 = vld [vmem:[#allocation2 + $0x98] sm:$0xff] }
  0x20   :  { %638 = vmatpush3.bf16.msra.mxu1 %v637_v50  ;;  %v649_v61 = vpack.c.bf16 %v228_v60, %v227_v59  ;;  %v231_v4 = vld [vmem:[#allocation2 + $0xa0] sm:$0xff]  ;;  %v232_v5 = vld [vmem:[#allocation2 + $0xa8] sm:$0xff]  ;;  %v233_v7 = vld [vmem:[#allocation2 + $0xb0] sm:$0xff] }
  0x21   :  { %617 = vmatpush3.bf16.msra.mxu0 %v616_v14  ;;  %639 = vmatprep.subr.bf16.mxu1 %v771_v0  ;;  %v655_v6 = vpack.c.bf16 %v232_v5, %v231_v4  ;;  %v234_v8 = vld [vmem:[#allocation2 + $0xb8] sm:$0xff]  ;;  %v235_v10 = vld [vmem:[#allocation2 + $0xc0] sm:$0xff]  ;;  %v236_v11 = vld [vmem:[#allocation2 + $0xc8] sm:$0xff] }
  0x22   :  { %618 = vmatprep.subr.bf16.mxu0 %v771_v0  ;;  %v658_v9 = vpack.c.bf16 %v234_v8, %v233_v7  ;;  %v661_v12 = vpack.c.bf16 %v236_v11, %v235_v10  ;;  %v238_v13 = vld [vmem:[#allocation2 + $0xd8] sm:$0xff]  ;;  %v239_v15 = vld [vmem:[#allocation2 + $0xe0] sm:$0xff]  ;;  %v240_v16 = vld [vmem:[#allocation2 + $0xe8] sm:$0xff] }
  0x23   :  { %v241_v21 = vld [vmem:[#allocation2 + $0xf0] sm:$0xff]  ;;  %v242_v22 = vld [vmem:[#allocation2 + $0xf8] sm:$0xff] }
  0x24   :  { %641 = vmatpush3.bf16.msra.mxu1 %v640_v52  ;;  %v670_v23 = vpack.c.bf16 %v242_v22, %v241_v21  ;;  %v465_v29 = vld [vmem:[#allocation2 + $0x150] ss:$0 sm:$0xff] }
  0x25   :  { %620 = vmatpush3.bf16.msra.mxu0 %v619_v17  ;;  %642 = vmatprep.subr.bf16.mxu1 %v771_v0  ;;  %v667_v17 = vpack.c.bf16 %v240_v16, %v239_v15 }
  0x26   :  { %621 = vmatprep.subr.bf16.mxu0 %v771_v0 }
  0x28   :  { %644 = vmatpush3.bf16.msra.mxu1 %v643_v55 }
  0x29   :  { %623 = vmatpush3.bf16.msra.mxu0 %v622_v20  ;;  %645 = vmatprep.subr.bf16.mxu1 %v771_v0 }
  0x2a   :  { %624 = vmatprep.subr.bf16.mxu0 %v771_v0 }
  0x2c   :  { %647 = vmatpush3.bf16.msra.mxu1 %v646_v58 }
  0x2d   :  { %626 = vmatpush3.bf16.msra.mxu0 %v625_v24  ;;  %648 = vmatprep.subr.bf16.mxu1 %v771_v0 }
  0x2e   :  { %627 = vmatprep.subr.bf16.mxu0 %v771_v0 }
  0x2f   :  { %572 = vmatmul.mubr.msk.f32.vlgmr.msra.gmra.mrb[0].mxu1 %vm251_vm3, %v825_v2 }
  0x30   :  { %650 = vmatpush3.bf16.msra.mxu1 %v649_v61  ;;  %606 = vmatprep.mubr.msk.f32.mxu1 %vm772_vm0, %v773_v1 }
  0x31   :  { %629 = vmatpush3.bf16.msra.mxu0 %v628_v27  ;;  %651 = vmatprep.subr.bf16.mxu1 %v771_v0 }
  0x32   :  { %630 = vmatprep.subr.bf16.mxu0 %v771_v0 }
  0x35   :  { %632 = vmatpush3.bf16.msra.mxu0 %v631_v30 }
  0x36   :  { %633 = vmatprep.subr.bf16.mxu0 %v771_v0 }
  0x38   :  { %546 = vmatmul.mubr.f32.vlgmr.msra.gmra.mrb[0].mxu0 %v838_v31 }
  0x39   :  { %552 = vmatprep.mubr.msk.f32.mxu0 %vm772_vm0, %v773_v1  ;;  %635 = vmatpush3.bf16.msra.mxu0 %v634_v46  ;;  %v237_v1 = vld [vmem:[#allocation2 + $0xd0] sm:$0xff] }
  0x3a   :  { %v664_v14 = vpack.c.bf16 %v238_v13, %v237_v1 }
  0xa6   :  { %v129_v32 = vpop.xlane.xlu0 %128 }
  0xa7   :  { %v130_v33 = vadd.f32 %v462_v3, %v129_v32  ;;  %v652_v3 = vpack.c.bf16 %v230_v63, %v229_v62 }
  0xa9   :  { %133 = vperm.xlu0 %683, %v130_v33   ;;  %653 = vmatpush3.bf16.msra.mxu1 %v652_v3 }
  0xaa   :  { %654 = vmatprep.subr.bf16.mxu1 %v771_v0 }
  0xad   :  { %656 = vmatpush3.bf16.msra.mxu1 %v655_v6 }
  0xae   :  { %657 = vmatprep.subr.bf16.mxu1 %v771_v0 }
  0xb1   :  { %659 = vmatpush3.bf16.msra.mxu1 %v658_v9 }
  0xb2   :  { %660 = vmatprep.subr.bf16.mxu1 %v771_v0 }
  0xb5   :  { %662 = vmatpush3.bf16.msra.mxu1 %v661_v12 }
  0xb6   :  { %663 = vmatprep.subr.bf16.mxu1 %v771_v0 }
  0xb9   :  { %665 = vmatpush3.bf16.msra.mxu1 %v664_v14 }
  0xba   :  { %666 = vmatprep.subr.bf16.mxu1 %v771_v0 }
  0xbd   :  { %668 = vmatpush3.bf16.msra.mxu1 %v667_v17 }
  0xbe   :  { %669 = vmatprep.subr.bf16.mxu1 %v771_v0 }
  0xc1   :  { %671 = vmatpush3.bf16.msra.mxu1 %v670_v23 }
 0x102   :  { %v321_v24 = vpop.f32.mrb[0].mxu1 }
 0x103   :  { %v573_v25 = vpop.f32.mrb[1].mxu1 }
 0x10b   :  { %v116_v34 = vpop.f32.mrb[0].mxu0 }
 0x10c   :  { %v547_v35 = vpop.f32.mrb[1].mxu0 }
 0x128   :  { %v134_v36 = vpop.permute.xlu0 %133 }
 0x129   :  { %v136_v37 = vadd.f32 %v134_v36, %v116_v34 }
 0x12b   :  { %v138_v38 = vsel %vm137_vm2, %v136_v37, -inf }
 0x12c   :  { %139 = vmax.xlane.f32.xlu1 %v138_v38 }
 0x1b9   :  { %v140_v39 = vpop.xlane.xlu1 %139 }
 0x1ba   :  { %v141_v40 = vsub.f32 %v136_v37, %v140_v39 }
 0x1bc   :  { %v142_v41 = vmul.f32 1.442695, %v141_v40 }
 0x1be   :  { %684 = vpow2.f32 %v142_v41 }
 0x1c8   :  { %v844_v42 = vpop.eup %684 }
 0x1c9   :  { %v144_v43 = vsel %vm137_vm2, %v844_v42, 0.0 }
 0x1ca   :  { %145 = vadd.xlane.f32.xlu1 %v144_v43 }
 0x257   :  { %v146_v18 = vpop.xlane.xlu1 %145 }
 0x258   :  { %686 = vrcp.f32 %v146_v18 }
 0x262   :  { %v687_v19 = vpop.eup %686 }
 0x263   :  { %v148_v20 = vmul.f32 %v687_v19, %v844_v42 }
 0x265   :  { %553 = vmatmul.mubr.msk.f32.vlgmr.msra.gmra.mrb[2].mxu0 %vm151_vm4, %v148_v20 }
 0x338   :  { %v221_v26 = vpop.f32.mrb[2].mxu0 }
 0x339   :  { %v225_v27 = vmul.f32 %v221_v26, %v838_v31  ;;  %v554_v28 = vpop.f32.mrb[3].mxu0 }
 0x33b   :  { %226 = vst [vmem:[#allocation5] sm:$0x3] %v225_v27  ;;  %607 = vmatmul.mubr.f32.vlgmr.msra.gmra.mrb[2].mxu1 %v225_v27 }
 0x40e   :  { %v391_v0 = vpop.f32.mrb[2].mxu1 }
 0x40f   :  { %v392_v30 = vadd.f32 %v391_v0, %v321_v24  ;;  %v608_v32 = vpop.f32.mrb[3].mxu1 }
 0x411   :  { %v400_v33 = vadd.f32 %v465_v29, %v392_v30 }
 0x413   :  { %688 = vtanh.f32 %v400_v33  ;;  %v466_v35 = vmul.f32 -1.442695, %v400_v33 }
 0x415   :  { %690 = vpow2.f32 %v466_v35 }
 0x41d   :  { %v689_v34 = vpop.eup %688 }
 0x41e   :  { %410 = vrot.lane.b32.xlu1 %v689_v34, %s775_s0 }
 0x41f   :  { %v691_v36 = vpop.eup %690 }
 0x420   :  { %v404_v37 = vadd.f32 1.0, %v691_v36 }
 0x422   :  { %692 = vrcp.f32 %v404_v37 }
 0x42c   :  { %v693_v38 = vpop.eup %692 }
 0x42d   :  { %v408_v40 = vmul.f32 %v693_v38, %v825_v2 }
 0x490   :  { %v411_v39 = vpop.permute.xlu1 %410 }
 0x491   :  { %v413_v31 = vmul.f32 %v693_v38, %v411_v39 }
 0x493   :  { %415 = vrot.lane.b32.xlu1 %v413_v31, %s776_s5 }
 0x505   :  { %v416_v41 = vpop.permute.xlu1 %415 }
 0x506   :  { %v418_v42 = vadd.f32 %v416_v41, %v408_v40 }
 0x508   :  { %694 = vtanh.f32 %v418_v42 }
 0x512   :  { %v695_v43 = vpop.eup %694 }
 0x513   :  { %421 = vrot.lane.b32.xlu1 %v695_v43, %s775_s0 }
 0x514   :  { %729 = shalt.err (!%p726_p12)
}
 0x515   :  { %s730_s11 = scalar_lea.hbm %s891_s3, 32 }
 0x516   :  { %p731_p13 = scmp.ne.s32.totalorder %s891_s3, %s730_s11  ;;  %p734_p0 = scmp.lt.u32.totalorder %s730_s11, %s891_s3 }
 0x518   :  { %p736_p1 = pnand %p734_p0, %p731_p13 }
 0x51a   :  { %739 = shalt.err (!%p736_p1)
}
 0x51b   :  { %442 = dma.vmem_to_hbm [thread:$0]  %s440_s7, 32, %s891_s3, [#allocation4]   ;;  %vm429_vm5 = vcmask 254976   ;;  %vm431_vm6 = vcmask 517376  }
 0x51c   :  { %s778_s18 = smov [#allocation6]  }
 0x51d   :  { %s449_s19 = sshll.u32 %s778_s18, 4  ;;  %s450_s19 = int_to_ptr.vmem [resolvable:$true] %s449_s19 }
 0x51e   :  { %s740_s20 = scalar_lea.vmem %s450_s19, 32  ;;  %p745_p3 = scmp.lt.s32.totalorder %s450_s19, %s450_s19 }
 0x51f   :  { %p741_p2 = scmp.ne.s32.totalorder %s450_s19, %s740_s20  ;;  %p746_p4 = scmp.lt.s32.totalorder %s740_s20, %s740_s20 }
 0x521   :  { %p747_p5 = por %p746_p4, %p745_p3 }
 0x523   :  { %p748_p6 = pnand %p747_p5, %p741_p2 }
 0x585   :  { %v422_v2 = vpop.permute.xlu1 %421 }
 0x586   :  { %v424_v44 = vmul.f32 %v693_v38, %v422_v2 }
 0x588   :  { %426 = vrot.lane.b32.xlu1 %v424_v44, %s776_s5 }
 0x5fa   :  { %v427_v45 = vpop.permute.xlu1 %426 }
 0x5fb   :  { %430 = vst.msk [vmem:[#allocation6] sm:$0x3] %vm429_vm5, %v427_v45 }
 0x5fc   :  { %432 = vst.msk [vmem:[#allocation6] sm:$0x3] %vm431_vm6, %v418_v42 }
 0x5fd   :  { %751 = shalt.err (!%p748_p6)
}
 0x5fe   :  { %s752_s22 = scalar_lea.hbm %s892_s4, 32 }
 0x5ff   :  { %p753_p7 = scmp.ne.s32.totalorder %s892_s4, %s752_s22  ;;  %p756_p8 = scmp.lt.u32.totalorder %s752_s22, %s892_s4 }
 0x601   :  { %p758_p9 = pnand %p756_p8, %p753_p7 }
 0x603   :  { %761 = shalt.err (!%p758_p9)
}
 0x604   :  { %452 = dma.vmem_to_hbm [thread:$0]  %s450_s19, 32, %s892_s4, [#allocation7]  }
 0x605   :  { %764 = dma.done.wait [#allocation4], 32  }
 0x606   :  { %765 = vsyncadd [#allocation4], 4294967264 }
 0x607   :  { %766 = dma.done.wait [#allocation7], 32  }
 0x608   :  { %767 = vsyncadd [#allocation7], 4294967264 }
 0x609   :  { %459 = vsyncpa [#allocation3], 1 }
 0x60a   :  { %460 = vsyncpa [#allocation4], 1 }
 0x60b   :  { %461 = vsyncpa [#allocation7], 1 }

</bundles_post_ra>
